<compile_context>
chip_gen: v7x
topology: tpu7x:2x2x1
jax: 0.10.0
libtpu: 0.0.40
codegen_flags: <defaults>
</compile_context>

<pallas_src>
import functools

import jax
import jax.numpy as jnp
import numpy as np
from jax.experimental import pallas as pl
from jax.experimental.pallas import tpu as pltpu


def _round_up(x, m):
    return ((x + m - 1) // m) * m


def _vmem_capacity_bytes():
    """Physical VMEM per TensorCore, with safe fallbacks."""
    try:
        return int(pltpu.get_tpu_info().vmem_capacity_bytes)
    except Exception:
        pass
    try:
        kind = jax.devices()[0].device_kind.lower()
        if "v7" in kind:
            return 64 << 20
    except Exception:
        pass
    return 128 << 20


def _num_tensorcores_per_chip():
    try:
        kind = jax.devices()[0].device_kind.lower()
        if "v7" in kind:
            return 2
    except Exception:
        pass
    return 1


def _ffn_kernel(x_ref, w1_ref, b1_ref, w2_ref, b2_ref, o_ref, acc_ref):
    # x_ref:  (tm, dm_p)     row tile of x
    # w1_ref: (dm_p, t_ff)   d_ff slice of W1
    # b1_ref: (1, t_ff)      d_ff slice of b1
    # w2_ref: (t_ff, dm_p)   d_ff slice of W2
    # b2_ref: (1, dm_p)      grid-invariant
    # o_ref:  (tm, dm_p)     output row tile (written once, at k == last)
    # acc_ref:(tm, dm_p) f32 scratch, resident across the k (d_ff) axis
    k = pl.program_id(1)
    last = pl.num_programs(1) - 1
    is_first = k == 0
    is_last = k == last

    # Hot path 1: x @ W1[:, k-chunk] + b1[k-chunk], ReLU (MXU, f32 accumulate).
    h = jnp.dot(x_ref[...], w1_ref[...], preferred_element_type=jnp.float32)
    h = jnp.maximum(h + b1_ref[...].astype(jnp.float32), 0.0)
    # TODO(synk): dropout is identity in eval mode; training-mode dropout would
    # draw a keep-mask here via pltpu.prng_seed / pltpu.stateful_bernoulli.

    # Hot path 2: partial = ReLU(.) @ W2[k-chunk, :]  (f32 accumulate).
    partial = jnp.dot(h.astype(w2_ref.dtype), w2_ref[...],
                      preferred_element_type=jnp.float32)

    # Accumulate across k; fused epilogue on the last k step so the final
    # partial never round-trips through the f32 accumulator.
    @pl.when(jnp.logical_and(is_first, jnp.logical_not(is_last)))
    def _():
        acc_ref[...] = partial

    @pl.when(jnp.logical_and(jnp.logical_not(is_first), jnp.logical_not(is_last)))
    def _():
        acc_ref[...] += partial

    @pl.when(jnp.logical_and(is_last, jnp.logical_not(is_first)))
    def _():
        o_ref[...] = (acc_ref[...] + partial
                      + b2_ref[...].astype(jnp.float32)).astype(o_ref.dtype)

    @pl.when(jnp.logical_and(is_last, is_first))
    def _():
        o_ref[...] = (partial
                      + b2_ref[...].astype(jnp.float32)).astype(o_ref.dtype)


@functools.partial(jax.jit, static_argnames=("tm", "t_ff", "compute_dtype"))
def feed_forward(x, w1, b1, w2, b2, *, tm=512, t_ff=1024, compute_dtype=None):
    """Position-wise FFN: relu(x @ w1 + b1) @ w2 + b2 (dropout = identity).

    x: (B, S, d_model); w1: (d_model, d_ff); b1: (d_ff,);
    w2: (d_ff, d_model); b2: (d_model,).  Returns (B, S, d_model) in x.dtype.
    compute_dtype: optionally cast x/w1/w2 (e.g. jnp.bfloat16) for full MXU
    rate and halved weight HBM bytes; accumulation stays f32 either way.
    """
    B, S, d_model = x.shape
    d_ff = w1.shape[1]
    M = B * S
    out_dtype = x.dtype

    if compute_dtype is not None:
        x = x.astype(compute_dtype)
        w1 = w1.astype(compute_dtype)
        w2 = w2.astype(compute_dtype)

    x_it = x.dtype.itemsize
    w_it = w1.dtype.itemsize
    b_it = b1.dtype.itemsize
    o_it = out_dtype.itemsize

    dm_p = _round_up(d_model, 128)
    dff_128 = _round_up(d_ff, 128)

    # ---- generation-aware tile selection (all static / trace-time) --------
    vmem_cap = _vmem_capacity_bytes()
    budget = max(vmem_cap - (16 << 20), 16 << 20)     # leave headroom

    t_ff = max(128, (min(t_ff, dff_128) // 128) * 128)
    tm = max(8, (min(tm, _round_up(M, 8)) // 8) * 8)

    def vmem_est(tm_, tff_):
        # Double-buffered in/out tiles + resident f32 accumulator + the f32
        # ReLU(h) intermediate between the two dots + internal scratch slack.
        return (2 * tm_ * dm_p * x_it          # x tile
                + 2 * dm_p * tff_ * w_it       # W1 tile
                + 2 * 8 * tff_ * b_it          # b1 tile (sublane padded)
                + 2 * tff_ * dm_p * w_it       # W2 tile
                + 2 * 8 * dm_p * b_it          # b2 tile
                + 2 * tm_ * dm_p * o_it        # out tile
                + tm_ * dm_p * 4               # f32 accumulator scratch
                + tm_ * tff_ * 4               # f32 h intermediate
                + (2 << 20))                   # Mosaic internal scratch

    while vmem_est(tm, t_ff) > budget and t_ff > 256:
        t_ff = max(128, (t_ff // 2 // 128) * 128)
    while vmem_est(tm, t_ff) > budget and tm > 8:
        tm = max(8, (tm // 2 // 8) * 8)
    # TODO(synk): for very large d_model (>=8K, esp. v7x 64 MiB VMEM) add an
    # output-d_model grid axis instead of shrinking tm/t_ff further.

    # Prefer a t_ff that divides the 128-padded d_ff: no weight padding copy.
    dff_p = _round_up(d_ff, t_ff)
    for cand in range(t_ff, max(128, t_ff // 2) - 1, -128):
        if dff_128 % cand == 0:
            t_ff = cand
            dff_p = dff_128
            break

    # v7x has 2 TensorCores/chip: guarantee >= 2 tiles on the parallel M axis.
    m_p = _round_up(M, tm)
    if _num_tensorcores_per_chip() >= 2 and m_p // tm < 2 and M > 8:
        tm = _round_up((M + 1) // 2, 8)
        m_p = _round_up(M, tm)

    grid = (m_p // tm, dff_p // t_ff)

    # ---- conditional padding (no copies in the aligned common case) -------
    def maybe_pad2(a, rows, cols):
        pr, pc = rows - a.shape[0], cols - a.shape[1]
        if pr == 0 and pc == 0:
            return a
        return jnp.pad(a, ((0, pr), (0, pc)))

    x2d = maybe_pad2(x.reshape(M, d_model), m_p, dm_p)
    w1p = maybe_pad2(w1, dm_p, dff_p)
    b1p = maybe_pad2(b1.reshape(1, d_ff), 1, dff_p)
    w2p = maybe_pad2(w2, dff_p, dm_p)
    b2p = maybe_pad2(b2.reshape(1, d_model), 1, dm_p)

    # Weights are re-streamed once per row tile: tell XLA the truth.
    weight_bytes = (w1p.size + w2p.size) * w_it + (b1p.size + b2p.size) * b_it
    cost = pl.CostEstimate(
        flops=4 * m_p * dm_p * dff_p,            # two matmuls
        transcendentals=0,
        bytes_accessed=(x2d.size * x_it + m_p * dm_p * o_it
                        + grid[0] * weight_bytes),
    )

    vmem_limit = int(min(max(vmem_est(tm, t_ff) + (8 << 20), 32 << 20),
                         vmem_cap - (8 << 20)))

    out2d = pl.pallas_call(
        _ffn_kernel,
        out_shape=jax.ShapeDtypeStruct((m_p, dm_p), out_dtype),
        grid_spec=pltpu.PrefetchScalarGridSpec(
            num_scalar_prefetch=0,
            grid=grid,
            in_specs=[
                pl.BlockSpec((tm, dm_p), lambda i, k: (i, 0)),     # x rows
                pl.BlockSpec((dm_p, t_ff), lambda i, k: (0, k)),   # W1 slice
                pl.BlockSpec((1, t_ff), lambda i, k: (0, k)),      # b1 slice
                pl.BlockSpec((t_ff, dm_p), lambda i, k: (k, 0)),   # W2 slice
                pl.BlockSpec((1, dm_p), lambda i, k: (0, 0)),      # b2
            ],
            out_specs=pl.BlockSpec((tm, dm_p), lambda i, k: (i, 0)),
            scratch_shapes=[pltpu.VMEM((tm, dm_p), jnp.float32)],
        ),
        compiler_params=pltpu.CompilerParams(
            dimension_semantics=("parallel", "arbitrary"),
            vmem_limit_bytes=vmem_limit,
        ),
        cost_estimate=cost,
    )(x2d, w1p, b1p, w2p, b2p)

    return out2d[:M, :d_model].reshape(B, S, d_model)


if __name__ == "__main__":
    # Small shapes consistent with the module's forward (B, S, d_model).
    B, S = 2, 8
    d_model, d_ff = 64, 256

    key = jax.random.PRNGKey(0)
    kx, k1, k2, k3, k4 = jax.random.split(key, 5)

    x = jax.random.normal(kx, (B, S, d_model), dtype=jnp.float32)

    # PyTorch Linear init ranges; weights stored pre-transposed as (in, out).
    lim1 = 1.0 / float(np.sqrt(d_model))
    lim2 = 1.0 / float(np.sqrt(d_ff))
    w1 = jax.random.uniform(k1, (d_model, d_ff), jnp.float32, -lim1, lim1)
    b1 = jax.random.uniform(k2, (d_ff,), jnp.float32, -lim1, lim1)
    w2 = jax.random.uniform(k3, (d_ff, d_model), jnp.float32, -lim2, lim2)
    b2 = jax.random.uniform(k4, (d_model,), jnp.float32, -lim2, lim2)

    # Small explicit tiles so the multi-k accumulate path AND the fused
    # last-k epilogue are both exercised: grid = (2 row tiles, 2 d_ff tiles).
    out = feed_forward(x, w1, b1, w2, b2, tm=8, t_ff=128)
    out = jax.block_until_ready(out)

    # float64 host reference.
    xr = np.asarray(x, np.float64).reshape(B * S, d_model)
    h = np.maximum(xr @ np.asarray(w1, np.float64) + np.asarray(b1, np.float64), 0.0)
    ref = (h @ np.asarray(w2, np.float64) + np.asarray(b2, np.float64))
    ref = ref.reshape(B, S, d_model)

    assert out.shape == (B, S, d_model)
    assert out.dtype == x.dtype
    err = float(np.max(np.abs(np.asarray(out, np.float64) - ref)))
    assert err < 1e-3, f"mismatch vs reference: max abs err = {err}"

    print("KERNEL_OK")
</pallas_src>

<mosaic_0001>
module attributes {stable_mosaic.version = 11 : i64} {
  func.func @_ffn_kernel(%arg0: i32, %arg1: i32, %arg2: memref<8x128xf32, #tpu.memory_space<vmem>>, %arg3: memref<128x128xf32, #tpu.memory_space<vmem>>, %arg4: memref<1x128xf32, #tpu.memory_space<vmem>>, %arg5: memref<128x128xf32, #tpu.memory_space<vmem>>, %arg6: memref<1x128xf32, #tpu.memory_space<vmem>>, %arg7: memref<8x128xf32, #tpu.memory_space<vmem>>, %arg8: memref<8x128xf32, #tpu.memory_space<vmem>>) attributes {dimension_semantics = [#tpu.dimension_semantics<parallel>, #tpu.dimension_semantics<arbitrary>], iteration_bounds = array<i64: 2, 2>, scalar_prefetch = 0 : i64, scratch_operands = 1 : i64, tpu.core_type = #tpu.core_type<tc>, window_params = [{transform_indices = @transform_0, window_bounds = array<i64: 8, 128>}, {transform_indices = @transform_1, window_bounds = array<i64: 128, 128>}, {transform_indices = @transform_2, window_bounds = array<i64: 1, 128>}, {transform_indices = @transform_3, window_bounds = array<i64: 128, 128>}, {pipeline_mode = #tpu.pipeline_mode<synchronous>, transform_indices = @transform_4, window_bounds = array<i64: 1, 128>}, {transform_indices = @transform_5, window_bounds = array<i64: 8, 128>}]} {
    %c0_i32 = arith.constant 0 : i32
    %0 = arith.cmpi eq, %arg1, %c0_i32 : i32
    %c1_i32 = arith.constant 1 : i32
    %1 = arith.cmpi eq, %arg1, %c1_i32 : i32
    %c0 = arith.constant 0 : index
    %c0_0 = arith.constant 0 : index
    %2 = vector.load %arg2[%c0, %c0_0] : memref<8x128xf32, #tpu.memory_space<vmem>>, vector<8x128xf32>
    %c0_1 = arith.constant 0 : index
    %c0_2 = arith.constant 0 : index
    %3 = vector.load %arg3[%c0_1, %c0_2] : memref<128x128xf32, #tpu.memory_space<vmem>>, vector<128x128xf32>
    %cst = arith.constant dense<0.000000e+00> : vector<8x128xf32>
    %4 = tpu.matmul %2, %3, %cst {dimension_numbers = #tpu.dot_dimension_numbers<[1], [0], [0], [1], [0, 0, 1, 1], [], []>} : vector<8x128xf32>, vector<128x128xf32>, vector<8x128xf32> -> vector<8x128xf32>
    %c0_3 = arith.constant 0 : index
    %c0_4 = arith.constant 0 : index
    %5 = vector.load %arg4[%c0_3, %c0_4] : memref<1x128xf32, #tpu.memory_space<vmem>>, vector<1x128xf32>
    %6 = vector.broadcast %5 : vector<1x128xf32> to vector<8x128xf32>
    %7 = arith.addf %4, %6 : vector<8x128xf32>
    %cst_5 = arith.constant 0.000000e+00 : f32
    %8 = vector.broadcast %cst_5 : f32 to vector<8x128xf32>
    %9 = arith.maximumf %7, %8 : vector<8x128xf32>
    %c0_6 = arith.constant 0 : index
    %c0_7 = arith.constant 0 : index
    %10 = vector.load %arg5[%c0_6, %c0_7] : memref<128x128xf32, #tpu.memory_space<vmem>>, vector<128x128xf32>
    %cst_8 = arith.constant dense<0.000000e+00> : vector<8x128xf32>
    %11 = tpu.matmul %9, %10, %cst_8 {dimension_numbers = #tpu.dot_dimension_numbers<[1], [0], [0], [1], [0, 0, 1, 1], [], []>} : vector<8x128xf32>, vector<128x128xf32>, vector<8x128xf32> -> vector<8x128xf32>
    %true = arith.constant true
    %12 = arith.xori %1, %true : i1
    %13 = arith.andi %0, %12 : i1
    %14 = arith.extui %13 : i1 to i32
    %c0_i32_9 = arith.constant 0 : i32
    %15 = arith.cmpi ne, %14, %c0_i32_9 : i32
    scf.if %15 {
      %c0_16 = arith.constant 0 : index
      %c0_17 = arith.constant 0 : index
      %28 = vector.load %arg8[%c0_16, %c0_17] : memref<8x128xf32, #tpu.memory_space<vmem>>, vector<8x128xf32>
      tpu.vector_store %arg8[%c0_16, %c0_17], %11 {strides = array<i32>} : memref<8x128xf32, #tpu.memory_space<vmem>>, vector<8x128xf32>,
    } else {
    }
    %true_10 = arith.constant true
    %16 = arith.xori %0, %true_10 : i1
    %true_11 = arith.constant true
    %17 = arith.xori %1, %true_11 : i1
    %18 = arith.andi %16, %17 : i1
    %19 = arith.extui %18 : i1 to i32
    %c0_i32_12 = arith.constant 0 : i32
    %20 = arith.cmpi ne, %19, %c0_i32_12 : i32
    scf.if %20 {
      %c0_16 = arith.constant 0 : index
      %c0_17 = arith.constant 0 : index
      %28 = vector.load %arg8[%c0_16, %c0_17] : memref<8x128xf32, #tpu.memory_space<vmem>>, vector<8x128xf32>
      %29 = arith.addf %28, %11 : vector<8x128xf32>
      %c0_18 = arith.constant 0 : index
      %c0_19 = arith.constant 0 : index
      %30 = vector.load %arg8[%c0_18, %c0_19] : memref<8x128xf32, #tpu.memory_space<vmem>>, vector<8x128xf32>
      tpu.vector_store %arg8[%c0_18, %c0_19], %29 {strides = array<i32>} : memref<8x128xf32, #tpu.memory_space<vmem>>, vector<8x128xf32>,
    } else {
    }
    %true_13 = arith.constant true
    %21 = arith.xori %0, %true_13 : i1
    %22 = arith.andi %1, %21 : i1
    %23 = arith.extui %22 : i1 to i32
    %c0_i32_14 = arith.constant 0 : i32
    %24 = arith.cmpi ne, %23, %c0_i32_14 : i32
    scf.if %24 {
      %c0_16 = arith.constant 0 : index
      %c0_17 = arith.constant 0 : index
      %28 = vector.load %arg8[%c0_16, %c0_17] : memref<8x128xf32, #tpu.memory_space<vmem>>, vector<8x128xf32>
      %29 = arith.addf %28, %11 : vector<8x128xf32>
      %c0_18 = arith.constant 0 : index
      %c0_19 = arith.constant 0 : index
      %30 = vector.load %arg6[%c0_18, %c0_19] : memref<1x128xf32, #tpu.memory_space<vmem>>, vector<1x128xf32>
      %31 = vector.broadcast %30 : vector<1x128xf32> to vector<8x128xf32>
      %32 = arith.addf %29, %31 : vector<8x128xf32>
      %c0_20 = arith.constant 0 : index
      %c0_21 = arith.constant 0 : index
      %33 = vector.load %arg7[%c0_20, %c0_21] : memref<8x128xf32, #tpu.memory_space<vmem>>, vector<8x128xf32>
      tpu.vector_store %arg7[%c0_20, %c0_21], %32 {strides = array<i32>} : memref<8x128xf32, #tpu.memory_space<vmem>>, vector<8x128xf32>,
    } else {
    }
    %25 = arith.andi %1, %0 : i1
    %26 = arith.extui %25 : i1 to i32
    %c0_i32_15 = arith.constant 0 : i32
    %27 = arith.cmpi ne, %26, %c0_i32_15 : i32
    scf.if %27 {
      %c0_16 = arith.constant 0 : index
      %c0_17 = arith.constant 0 : index
      %28 = vector.load %arg6[%c0_16, %c0_17] : memref<1x128xf32, #tpu.memory_space<vmem>>, vector<1x128xf32>
      %29 = vector.broadcast %28 : vector<1x128xf32> to vector<8x128xf32>
      %30 = arith.addf %11, %29 : vector<8x128xf32>
      %c0_18 = arith.constant 0 : index
      %c0_19 = arith.constant 0 : index
      %31 = vector.load %arg7[%c0_18, %c0_19] : memref<8x128xf32, #tpu.memory_space<vmem>>, vector<8x128xf32>
      tpu.vector_store %arg7[%c0_18, %c0_19], %30 {strides = array<i32>} : memref<8x128xf32, #tpu.memory_space<vmem>>, vector<8x128xf32>,
    } else {
    }
    return
  }
  func.func @transform_0(%arg0: i32, %arg1: i32) -> (i32, i32) {
    %c0_i32 = arith.constant 0 : i32
    %c0_i32_0 = arith.constant 0 : i32
    return %arg0, %c0_i32 : i32, i32
  }
  func.func @transform_1(%arg0: i32, %arg1: i32) -> (i32, i32) {
    %c0_i32 = arith.constant 0 : i32
    %c0_i32_0 = arith.constant 0 : i32
    return %c0_i32, %arg1 : i32, i32
  }
  func.func @transform_2(%arg0: i32, %arg1: i32) -> (i32, i32) {
    %c0_i32 = arith.constant 0 : i32
    %c0_i32_0 = arith.constant 0 : i32
    return %c0_i32, %arg1 : i32, i32
  }
  func.func @transform_3(%arg0: i32, %arg1: i32) -> (i32, i32) {
    %c0_i32 = arith.constant 0 : i32
    %c0_i32_0 = arith.constant 0 : i32
    return %arg1, %c0_i32 : i32, i32
  }
  func.func @transform_4(%arg0: i32, %arg1: i32) -> (i32, i32) {
    %c0_i32 = arith.constant 0 : i32
    %c0_i32_0 = arith.constant 0 : i32
    %c0_i32_1 = arith.constant 0 : i32
    return %c0_i32, %c0_i32_0 : i32, i32
  }
  func.func @transform_5(%arg0: i32, %arg1: i32) -> (i32, i32) {
    %c0_i32 = arith.constant 0 : i32
    %c0_i32_0 = arith.constant 0 : i32
    return %arg0, %c0_i32 : i32, i32
  }
}

</mosaic_0001>

<bundles_post_ra>
// kernel: feed_forward.1
= control target key start
LH: loop header
LB: loop body
LE: loop exit
PB: predicated region body
PF: predicated region fallthrough
CT: control target
= control target key end

     0   :  { %s1027_s18 = smov 0   ;;  %s1029_s19 = smov 0   ;;  %s1224_s0 = inlined_call_operand.vmem [shape: f32[16,128], index: 0, kind: input, shape index: {}]   ;;  %s1225_s1 = inlined_call_operand.vmem [shape: f32[128,256], index: 1, kind: input, shape index: {}]   ;;  %s1226_s2 = inlined_call_operand.vmem [shape: f32[1,256], index: 2, kind: input, shape index: {}]   ;;  %s1227_s3 = inlined_call_operand.vmem [shape: f32[256,128], index: 3, kind: input, shape index: {}]   ;;  %s1228_s4 = inlined_call_operand.vmem [shape: f32[1,128], index: 4, kind: input, shape index: {}]   ;;  %s1229_s5 = inlined_call_operand.vmem [shape: f32[16,128], index: 5, kind: output, shape index: {}]  }
   0x1   :  { %s1031_s20 = smov 0   ;;  %s1033_s21 = smov 0  }
   0x2   :  { %s1035_s22 = smov 0   ;;  %s1037_s23 = smov 0  }
   0x3   :  { %s1039_s24 = smov 0  }
   0x4 LB: > { %s24_s25 = sadd.s32 1, %s984_s22  ;;  %s27_s26 = sadd.s32 1, %s988_s23  ;;  %s992_s24 = sphi %s1039_s24, %s15_s24   ;;  %s988_s23 = sphi %s1037_s23, %s1235_s23   ;;  %s984_s22 = sphi %s1035_s22, %s1234_s22   ;;  %s980_s21 = sphi %s1033_s21, %s1233_s21   ;;  %s976_s20 = sphi %s1031_s20, %s1232_s20   ;;  %s972_s19 = sphi %s1029_s19, %s1231_s19   ;;  %s968_s18 = sphi %s1027_s18, %s1230_s18  }
   0x5   : > { %p25_p0 = scmp.ge.s32.totalorder %s24_s25, 2  ;;  %s60_s27 = sadd.s32 1, %s972_s19 }
   0x6   : > { %p67_p1 = scmp.ne.s32.totalorder %s972_s19, %s968_s18  ;;  %p68_p2 = scmp.eq.s32.totalorder %s992_s24, 0 }
   0x7   : > { %s1237_s25 = smov (%p25_p0, %s24_s25), 0  ;;  %s1239_s26 = smov (!%p25_p0, %s27_s26), %s988_s23 }
   0x8   : > { %s57_s28 = ssub.s32 %s984_s22, %s1237_s25  ;;  %p69_p3 = por %p68_p2, %p67_p1 }
   0x9   : > { %p29_p4 = scmp.ge.s32.totalorder %s1239_s26, 2  ;;  %p58_p5 = scmp.eq.s32.totalorder %s57_s28, 0 }
   0xa   : > { %p713_p6 = scmp.ge.s32.totalorder %s992_s24, 4 }
   0xb   : > { %s1241_s26 = smov (%p29_p4, %s1239_s26), 0 }
   0xc   : > { %s1076_s29 = scalar_select %p58_p5, %s972_s19, %s60_s27  }
   0xd   : > { %195 = sbr.rel (%p713_p6) target bundleno = 32 (0x20), region = 20 }
  0x14   : > { %205 = sbr.rel (!%p69_p3) target bundleno = 32 (0x20), region = 28  ;;  %s207_s30 = sand.u32 (%p69_p3), 1, %s972_s19  }
  0x15   : > { %s715_s6 = sshll.u32 (%p69_p3), %s984_s22, 3  ;;  %s714_s7 = sshll.u32 (%p69_p3), %s207_s30, 7 }
  0x16   : > { %s1084_s10 = scalar_lea.vmem (%p69_p3), %s1225_s1, %s715_s6  ;;  %s209_s11 = scalar_lea.vmem (%p69_p3), [#allocation3], %s714_s7 }
  0x17   : > { %v269_v0 = vld [vmem:[%s1084_s10] sm:$0xff] (%p69_p3)  ;;  %v271_v1 = vld [vmem:[%s1084_s10 + $0x10] sm:$0xff] (%p69_p3) }
  0x18   : > { %v273_v2 = vld [vmem:[%s1084_s10 + $0x20] sm:$0xff] (%p69_p3)  ;;  %270 = vst [vmem:[%s209_s11] sm:$0xff] (%p69_p3), %v269_v0  ;;  %272 = vst [vmem:[%s209_s11 + $0x8] sm:$0xff] (%p69_p3), %v271_v1  ;;  %v275_v3 = vld [vmem:[%s1084_s10 + $0x30] sm:$0xff] (%p69_p3) }
  0x19   : > { %274 = vst [vmem:[%s209_s11 + $0x10] sm:$0xff] (%p69_p3), %v273_v2  ;;  %v277_v4 = vld [vmem:[%s1084_s10 + $0x40] sm:$0xff] (%p69_p3)  ;;  %v279_v5 = vld [vmem:[%s1084_s10 + $0x50] sm:$0xff] (%p69_p3)  ;;  %276 = vst [vmem:[%s209_s11 + $0x18] sm:$0xff] (%p69_p3), %v275_v3 }
  0x1a   : > { %278 = vst [vmem:[%s209_s11 + $0x20] sm:$0xff] (%p69_p3), %v277_v4  ;;  %280 = vst [vmem:[%s209_s11 + $0x28] sm:$0xff] (%p69_p3), %v279_v5  ;;  %v281_v6 = vld [vmem:[%s1084_s10 + $0x60] sm:$0xff] (%p69_p3)  ;;  %v283_v7 = vld [vmem:[%s1084_s10 + $0x70] sm:$0xff] (%p69_p3) }
  0x1b   : > { %v285_v8 = vld [vmem:[%s1084_s10 + $0x80] sm:$0xff]  ;;  %282 = vst [vmem:[%s209_s11 + $0x30] sm:$0xff] %v281_v6  ;;  %284 = vst [vmem:[%s209_s11 + $0x38] sm:$0xff] %v283_v7  ;;  %v287_v9 = vld [vmem:[%s1084_s10 + $0x90] sm:$0xff] }
  0x1c   : > { %286 = vst [vmem:[%s209_s11 + $0x40] sm:$0xff] %v285_v8  ;;  %v289_v10 = vld [vmem:[%s1084_s10 + $0xa0] sm:$0xff]  ;;  %v291_v11 = vld [vmem:[%s1084_s10 + $0xb0] sm:$0xff]  ;;  %288 = vst [vmem:[%s209_s11 + $0x48] sm:$0xff] %v287_v9 }
  0x1d   : > { %290 = vst [vmem:[%s209_s11 + $0x50] sm:$0xff] %v289_v10  ;;  %292 = vst [vmem:[%s209_s11 + $0x58] sm:$0xff] %v291_v11  ;;  %v293_v12 = vld [vmem:[%s1084_s10 + $0xc0] sm:$0xff]  ;;  %v295_v13 = vld [vmem:[%s1084_s10 + $0xd0] sm:$0xff] }
  0x1e   : > { %v297_v14 = vld [vmem:[%s1084_s10 + $0xe0] sm:$0xff]  ;;  %294 = vst [vmem:[%s209_s11 + $0x60] sm:$0xff] %v293_v12  ;;  %296 = vst [vmem:[%s209_s11 + $0x68] sm:$0xff] %v295_v13  ;;  %v299_v15 = vld [vmem:[%s1084_s10 + $0xf0] sm:$0xff] }
  0x1f   : > { %298 = vst [vmem:[%s209_s11 + $0x70] sm:$0xff] %v297_v14  ;;  %300 = vst [vmem:[%s209_s11 + $0x78] sm:$0xff] %v299_v15 }
  0x20 PF: > { %p716_p7 = scmp.ge.s32.totalorder %s992_s24, 1  ;;  %p320_p8 = scmp.lt.s32.totalorder %s992_s24, 5 }
  0x22   : > { %p321_p9 = pnand %p716_p7, %p320_p8 }
  0x23   : > { %p383_p10 = scmp.eq.s32.totalorder (!%p321_p9), %s976_s20, 1  ;;  %v994_v16 = vmov (!%p321_p9), 0.0|0.0   ;;  %s327_s12 = sand.u32 (!%p321_p9), 1, %s968_s18   ;;  %vm995_vm0 = vmmov (!%p321_p9), 0   ;;  %v996_v17 = vmov (!%p321_p9), 0.0  }
  0x24   : > { %324 = sbr.rel (%p321_p9) target bundleno = 533 (0x215), region = 74  ;;  %831 = vmatprep.subr.bf16.mxu0 (!%p321_p9), %v994_v16  ;;  %793 = vmatprep.mubr.msk.f32.mxu0 (!%p321_p9), %vm995_vm0, %v996_v17  ;;  %p365_p11 = scmp.lt.s32.totalorder (!%p321_p9), %s980_s21, 1 }
  0x25   : > { %s717_s13 = sshll.u32 (!%p321_p9), %s327_s12, 7  ;;  %855 = vmatprep.subr.bf16.mxu1 (!%p321_p9), %v994_v16  ;;  %s719_s14 = sshll.u32 (!%p321_p9), %s976_s20, 4  ;;  %828 = vmatprep.mubr.msk.f32.mxu1 (!%p321_p9), %vm995_vm0, %v996_v17 }
  0x26   : > { %p373_p12 = scmp.lt.s32.totalorder (!%p321_p9), %s719_s14, 31  ;;  %s1110_s15 = scalar_lea.vmem (!%p321_p9), [#allocation3], %s717_s13 }
  0x27   : > { %v385_v18 = vld [vmem:[%s1110_s15] sm:$0xff] (!%p321_p9)  ;;  %v386_v19 = vld [vmem:[%s1110_s15 + $0x8] sm:$0xff] (!%p321_p9)  ;;  %v387_v20 = vld [vmem:[%s1110_s15 + $0x10] sm:$0xff] (!%p321_p9)  ;;  %p369_p13 = scmp.lt.s32.totalorder (!%p321_p9), %s976_s20, 1  ;;  %p382_p0 = scmp.eq.s32.totalorder (!%p321_p9), %s976_s20, 0 }
  0x28   : > { %v832_v21 = vpack.c.bf16 (!%p321_p9), %v386_v19, %v385_v18  ;;  %v388_v22 = vld [vmem:[%s1110_s15 + $0x18] sm:$0xff] (!%p321_p9)  ;;  %v389_v24 = vld [vmem:[%s1110_s15 + $0x20] sm:$0xff] (!%p321_p9)  ;;  %v390_v25 = vld [vmem:[%s1110_s15 + $0x28] sm:$0xff] (!%p321_p9)  ;;  %p565_p1 = scmp.ne.s32.totalorder (!%p321_p9), %s976_s20, 1 }
  0x29   : > { %v835_v23 = vpack.c.bf16 (!%p321_p9), %v388_v22, %v387_v20  ;;  %v838_v29 = vpack.c.bf16 (!%p321_p9), %v390_v25, %v389_v24  ;;  %v391_v32 = vld [vmem:[%s1110_s15 + $0x30] sm:$0xff] (!%p321_p9)  ;;  %v392_v33 = vld [vmem:[%s1110_s15 + $0x38] sm:$0xff] (!%p321_p9)  ;;  %v393_v38 = vld [vmem:[%s1110_s15 + $0x40] sm:$0xff] (!%p321_p9) }
  0x2a   : > { %833 = vmatpush3.bf16.msra.mxu0 (!%p321_p9), %v832_v21  ;;  %v841_v37 = vpack.c.bf16 (!%p321_p9), %v392_v33, %v391_v32  ;;  %v394_v39 = vld [vmem:[%s1110_s15 + $0x48] sm:$0xff] (!%p321_p9)  ;;  %v395_v44 = vld [vmem:[%s1110_s15 + $0x50] sm:$0xff] (!%p321_p9)  ;;  %v396_v45 = vld [vmem:[%s1110_s15 + $0x58] sm:$0xff] (!%p321_p9)  ;;  %p566_p2 = pnand (!%p321_p9), %p565_p1, %p382_p0 }
  0x2b   : > { %s1243_s21 = smov (!%p365_p11, %s980_s21), 1  ;;  %s1245_s14 = smov (!%p373_p12, %s719_s14), 31  ;;  %834 = vmatprep.subr.bf16.mxu0 %v994_v16  ;;  %v844_v43 = vpack.c.bf16 %v394_v39, %v393_v38  ;;  %v847_v49 = vpack.c.bf16 %v396_v45, %v395_v44  ;;  %v397_v50 = vld [vmem:[%s1110_s15 + $0x60] sm:$0xff]  ;;  %v398_v51 = vld [vmem:[%s1110_s15 + $0x68] sm:$0xff]  ;;  %v399_v56 = vld [vmem:[%s1110_s15 + $0x70] sm:$0xff] }
  0x2c   : > { %s718_s16 = sshll.u32 %s1243_s21, 3  ;;  %s720_s28 = sshll.u32 %s1245_s14, 3  ;;  %v850_v55 = vpack.c.bf16 %v398_v51, %v397_v50  ;;  %v400_v57 = vld [vmem:[%s1110_s15 + $0x78] sm:$0xff] }
  0x2d   : > { %s1125_s27 = scalar_lea.vmem %s1229_s5, %s718_s16  ;;  %s1133_s7 = scalar_lea.vmem %s1227_s3, %s720_s28  ;;  %v853_v61 = vpack.c.bf16 %v400_v57, %v399_v56 }
  0x2e   : > { %v479_v26 = vld [vmem:[%s1133_s7] sm:$0xff]  ;;  %v480_v27 = vld [vmem:[%s1133_s7 + $0x8] sm:$0xff]  ;;  %v481_v28 = vld [vmem:[%s1133_s7 + $0x10] sm:$0xff]  ;;  %836 = vmatpush3.bf16.msra.mxu0 %v835_v23  ;;  %s368_s10 = scalar_lea.vmem %s1224_s0, %s718_s16 }
  0x2f   : > { %v856_v30 = vpack.c.bf16 %v480_v27, %v479_v26  ;;  %v482_v31 = vld [vmem:[%s1133_s7 + $0x18] sm:$0xff]  ;;  %837 = vmatprep.subr.bf16.mxu0 %v994_v16  ;;  %v483_v35 = vld [vmem:[%s1133_s7 + $0x20] sm:$0xff]  ;;  %v484_v36 = vld [vmem:[%s1133_s7 + $0x28] sm:$0xff]  ;;  %s370_s21 = scalar_select %p369_p13, %s976_s20, 1 }
  0x30   : > { %v859_v34 = vpack.c.bf16 %v482_v31, %v481_v28  ;;  %v862_v40 = vpack.c.bf16 %v484_v36, %v483_v35  ;;  %v485_v41 = vld [vmem:[%s1133_s7 + $0x30] sm:$0xff]  ;;  %v486_v42 = vld [vmem:[%s1133_s7 + $0x38] sm:$0xff]  ;;  %v487_v47 = vld [vmem:[%s1133_s7 + $0x40] sm:$0xff] }
  0x31   : > { %857 = vmatpush3.bf16.msra.mxu1 %v856_v30  ;;  %v865_v46 = vpack.c.bf16 %v486_v42, %v485_v41  ;;  %v488_v48 = vld [vmem:[%s1133_s7 + $0x48] sm:$0xff]  ;;  %v489_v53 = vld [vmem:[%s1133_s7 + $0x50] sm:$0xff]  ;;  %v490_v54 = vld [vmem:[%s1133_s7 + $0x58] sm:$0xff]  ;;  %s371_s13 = scalar_lea.vmem %s1226_s2, %s370_s21 }
  0x32   : > { %858 = vmatprep.subr.bf16.mxu1 %v994_v16  ;;  %839 = vmatpush3.bf16.msra.mxu0 %v838_v29  ;;  %v868_v52 = vpack.c.bf16 %v488_v48, %v487_v47  ;;  %v871_v58 = vpack.c.bf16 %v490_v54, %v489_v53  ;;  %v491_v59 = vld [vmem:[%s1133_s7 + $0x60] sm:$0xff]  ;;  %v492_v60 = vld [vmem:[%s1133_s7 + $0x68] sm:$0xff]  ;;  %v493_v0 = vld [vmem:[%s1133_s7 + $0x70] sm:$0xff] }
  0x33   : > { %840 = vmatprep.subr.bf16.mxu0 %v994_v16  ;;  %v874_v62 = vpack.c.bf16 %v492_v60, %v491_v59  ;;  %v384_v63 = vld [vmem:[%s368_s10] sm:$0xff]  ;;  %v494_v1 = vld [vmem:[%s1133_s7 + $0x78] sm:$0xff] }
  0x34   : > { %v877_v2 = vpack.c.bf16 %v494_v1, %v493_v0  ;;  %v722_v3 = vld [vmem:[%s371_s13] ss:$0 sm:$0xff] }
  0x35   : > { %860 = vmatpush3.bf16.msra.mxu1 %v859_v34 }
  0x36   : > { %861 = vmatprep.subr.bf16.mxu1 %v994_v16  ;;  %842 = vmatpush3.bf16.msra.mxu0 %v841_v37 }
  0x37   : > { %843 = vmatprep.subr.bf16.mxu0 %v994_v16 }
  0x39   : > { %863 = vmatpush3.bf16.msra.mxu1 %v862_v40 }
  0x3a   : > { %864 = vmatprep.subr.bf16.mxu1 %v994_v16  ;;  %845 = vmatpush3.bf16.msra.mxu0 %v844_v43 }
  0x3b   : > { %846 = vmatprep.subr.bf16.mxu0 %v994_v16 }
  0x3d   : > { %866 = vmatpush3.bf16.msra.mxu1 %v865_v46 }
  0x3e   : > { %867 = vmatprep.subr.bf16.mxu1 %v994_v16  ;;  %848 = vmatpush3.bf16.msra.mxu0 %v847_v49 }
  0x3f   : > { %849 = vmatprep.subr.bf16.mxu0 %v994_v16 }
  0x41   : > { %869 = vmatpush3.bf16.msra.mxu1 %v868_v52 }
  0x42   : > { %870 = vmatprep.subr.bf16.mxu1 %v994_v16  ;;  %851 = vmatpush3.bf16.msra.mxu0 %v850_v55 }
  0x43   : > { %852 = vmatprep.subr.bf16.mxu0 %v994_v16 }
  0x45   : > { %872 = vmatpush3.bf16.msra.mxu1 %v871_v58 }
  0x46   : > { %873 = vmatprep.subr.bf16.mxu1 %v994_v16  ;;  %854 = vmatpush3.bf16.msra.mxu0 %v853_v61 }
  0x49   : > { %875 = vmatpush3.bf16.msra.mxu1 %v874_v62  ;;  %794 = vmatmul.mubr.f32.vlgmr.msra.gmra.mrb[0].mxu0 %v384_v63 }
  0x4a   : > { %876 = vmatprep.subr.bf16.mxu1 %v994_v16 }
  0x4d   : > { %878 = vmatpush3.bf16.msra.mxu1 %v877_v2 }
 0x11c   : > { %v474_v4 = vpop.f32.mrb[0].mxu0 }
 0x11d   : > { %v475_v5 = vadd.f32 %v722_v3, %v474_v4  ;;  %v795_v6 = vpop.f32.mrb[1].mxu0 }
 0x11f   : > { %v478_v7 = vmax.f32 %v475_v5, 0.0 }
 0x121   : > { %829 = vmatmul.mubr.f32.vlgmr.msra.gmra.mrb[0].mxu1 %v478_v7 }
 0x1ef   : > { %569 = sbr.rel (%p566_p2) target bundleno = 502 (0x1f6), region = 82 }
 0x1f4   : > { %v561_v8 = vpop.f32.mrb[0].mxu1 }
 0x1f5   : > { %v830_v9 = vpop.f32.mrb[1].mxu1  ;;  %570 = vst [vmem:[#allocation2] sm:$0xff] (!%p566_p2), %v561_v8 }
 0x1f6 PF: > { %p571_p3 = scmp.ne.s32.totalorder %s976_s20, 0 }
 0x1f8   : > { %p572_p4 = pnand %p571_p3, %p565_p1 }
 0x1fa   : > { %575 = sbr.rel (%p572_p4) target bundleno = 513 (0x201), region = 86 }
 0x1fc   : > { %v576_v10 = vld [vmem:[#allocation2] sm:$0xff] (!%p572_p4) }
 0x1fd   : > { %v577_v11 = vadd.f32 (!%p572_p4), %v576_v10, %v561_v8 }
 0x1ff   : > { %578 = vst [vmem:[#allocation2] sm:$0xff] (!%p572_p4), %v577_v11 }
 0x201 PF: > { %p579_p5 = pnand %p571_p3, %p383_p10 }
 0x202   : > { %v723_v13 = vld [vmem:[%s1228_s4] ss:$0 sm:$0xff] (!%p579_p5) }
 0x203   : > { %582 = sbr.rel (%p579_p5) target bundleno = 524 (0x20c), region = 90 }
 0x206   : > { %v583_v12 = vld [vmem:[#allocation2] sm:$0xff] (!%p579_p5) }
 0x207   : > { %v584_v14 = vadd.f32 (!%p579_p5), %v583_v12, %v561_v8 }
 0x209   : > { %v592_v15 = vadd.f32 (!%p579_p5), %v723_v13, %v584_v14 }
 0x20b   : > { %593 = vst [vmem:[%s1125_s27] sm:$0xff] %v592_v15 }
 0x20c PF: > { %p594_p6 = pnand %p383_p10, %p382_p0 }
 0x20d   : > { %v724_v16 = vld [vmem:[%s1228_s4] ss:$0 sm:$0xff] (!%p594_p6) }
 0x20e   : > { %597 = sbr.rel (%p594_p6) target bundleno = 533 (0x215), region = 94  ;;  %v605_v17 = vadd.f32 (!%p594_p6), %v724_v16, %v561_v8 }
 0x210   : > { %606 = vst [vmem:[%s1125_s27] sm:$0xff] (!%p594_p6), %v605_v17 }
 0x215 PF: > { %s15_s24 = sadd.s32 1, %s992_s24   ;;  %s1230_s18 = smov %s972_s19 }
 0x216   : > { %p12_p7 = scmp.ge.s32.totalorder %s15_s24, 6   ;;  %s1231_s19 = smov %s1076_s29 }
 0x217   : > { %s1232_s20 = smov %s984_s22  ;;  %s1233_s21 = smov %s988_s23 }
 0x218   : > { %s1234_s22 = smov %s1237_s25  ;;  %s1235_s23 = smov %s1241_s26 }
 0x219   :  { %14 = sbr.rel (!%p12_p7) target bundleno = 4 (0x4), region = 138 }

</bundles_post_ra>
